<compile_context>
chip_gen: v6e
topology: v6e:2x2x1
jax: 0.10.0
libtpu: 0.0.40
codegen_flags: <defaults>
</compile_context>

<pallas_src>
import jax
import jax.numpy as jnp
from jax.experimental import pallas as pl
from jax.experimental.pallas import tpu as pltpu

K_PAD = 896    # 784 padded up to a multiple of 128
N_PAD = 128    # 10 logits padded up to a full lane width
BLOCK_B = 256  # target batch-tile rows per grid step (>=128 feeds the MXU)


def _round_up(n, m):
    return ((n + m - 1) // m) * m


def mlp_kernel(x_ref, w1_ref, b1_ref, w2_ref, b2_ref, wl_ref, bl_ref, out_ref):
    """Fused MLP forward for one batch tile: (Linear->ReLU) x2 -> Linear."""
    x = x_ref[...]                                                   # (TB, 896) bf16

    # fc layer 1 + ReLU (dropout p=0 / eval -> identity)
    h = jnp.dot(x, w1_ref[...], preferred_element_type=jnp.float32) + b1_ref[...]
    h = jnp.maximum(h, 0.0).astype(w2_ref.dtype)

    # fc layer 2 + ReLU
    h = jnp.dot(h, w2_ref[...], preferred_element_type=jnp.float32) + b2_ref[...]
    h = jnp.maximum(h, 0.0).astype(wl_ref.dtype)

    # last_layer (logits, padded to 128 lanes; padded cols are zero-weight/bias)
    out_ref[...] = (
        jnp.dot(h, wl_ref[...], preferred_element_type=jnp.float32) + bl_ref[...]
    )


def prepare_params(params, compute_dtype=jnp.bfloat16):
    """One-time prep: transpose to (in, out), pad K/N, cast weights to bf16."""
    (w1, b1), (w2, b2), (wl, bl) = params
    in_f = w1.shape[1]            # 784
    h1 = w1.shape[0]              # 128
    h2 = w2.shape[0]              # 128
    n_out = wl.shape[0]           # 10

    w1_t = jnp.zeros((K_PAD, h1), jnp.float32).at[:in_f, :].set(w1.T)
    w2_t = w2.T
    wl_t = jnp.zeros((h2, N_PAD), jnp.float32).at[:, :n_out].set(wl.T)
    bl_p = jnp.zeros((1, N_PAD), jnp.float32).at[0, :n_out].set(bl)

    return (
        w1_t.astype(compute_dtype), b1.reshape(1, -1).astype(jnp.float32),
        w2_t.astype(compute_dtype), b2.reshape(1, -1).astype(jnp.float32),
        wl_t.astype(compute_dtype), bl_p,
    )


def mnist_forward(x_nchw, prepared, block_b=BLOCK_B):
    """x_nchw: (B, 1, 28, 28) float32. Returns logits (B, 10) float32."""
    w1, b1, w2, b2, wl, bl = prepared
    B = x_nchw.shape[0]
    x_flat = x_nchw.reshape(B, -1)                       # torch.flatten(inputs, 1)
    K = x_flat.shape[1]

    # Pad batch to a sublane/tile-friendly size and pick the batch tile.
    B_pad = _round_up(B, 8)
    tb = min(block_b, B_pad)
    B_pad = _round_up(B_pad, tb)

    x_p = (
        jnp.zeros((B_pad, K_PAD), dtype=w1.dtype)
        .at[:B, :K]
        .set(x_flat.astype(w1.dtype))
    )

    h1, h2 = w1.shape[1], w2.shape[1]
    grid = (B_pad // tb,)

    flops = 2 * B_pad * (K_PAD * h1 + h1 * h2 + h2 * N_PAD)
    bytes_accessed = (
        x_p.size * x_p.dtype.itemsize
        + w1.size * w1.dtype.itemsize
        + w2.size * w2.dtype.itemsize
        + wl.size * wl.dtype.itemsize
        + (b1.size + b2.size + bl.size) * 4
        + B_pad * N_PAD * 4
    )

    out = pl.pallas_call(
        mlp_kernel,
        out_shape=jax.ShapeDtypeStruct((B_pad, N_PAD), jnp.float32),
        grid_spec=pltpu.PrefetchScalarGridSpec(
            num_scalar_prefetch=0,
            grid=grid,
            in_specs=[
                pl.BlockSpec((tb, K_PAD), lambda i: (i, 0)),   # activations: tiled
                pl.BlockSpec((K_PAD, h1), lambda i: (0, 0)),   # weights/biases: resident
                pl.BlockSpec((1, h1), lambda i: (0, 0)),
                pl.BlockSpec((h1, h2), lambda i: (0, 0)),
                pl.BlockSpec((1, h2), lambda i: (0, 0)),
                pl.BlockSpec((h2, N_PAD), lambda i: (0, 0)),
                pl.BlockSpec((1, N_PAD), lambda i: (0, 0)),
            ],
            out_specs=pl.BlockSpec((tb, N_PAD), lambda i: (i, 0)),
        ),
        compiler_params=pltpu.CompilerParams(
            dimension_semantics=("parallel",),
        ),
        cost_estimate=pl.CostEstimate(
            flops=flops, transcendentals=0, bytes_accessed=bytes_accessed
        ),
    )(x_p, w1, b1, w2, b2, wl, bl)

    return out[:B, :10]


def init_linear(key, in_features, out_features):
    """Deterministic PyTorch-style init: U(-1/sqrt(in), 1/sqrt(in))."""
    kw, kb = jax.random.split(key)
    bound = 1.0 / jnp.sqrt(jnp.float32(in_features))
    w = jax.random.uniform(kw, (out_features, in_features), jnp.float32, -bound, bound)
    b = jax.random.uniform(kb, (out_features,), jnp.float32, -bound, bound)
    return w, b


def reference_forward_f32(x_nchw, params):
    """Pure-JAX f32 reference of the PyTorch forward (eval mode)."""
    x = x_nchw.reshape(x_nchw.shape[0], -1)
    (w1, b1), (w2, b2), (wl, bl) = params
    x = jnp.maximum(x @ w1.T + b1, 0.0)
    x = jnp.maximum(x @ w2.T + b2, 0.0)
    return x @ wl.T + bl


def reference_forward_bf16(x_nchw, params):
    """Pure-JAX reference matching the kernel's bf16-input / f32-accum numerics."""
    bf16 = jnp.bfloat16
    x = x_nchw.reshape(x_nchw.shape[0], -1).astype(bf16)
    (w1, b1), (w2, b2), (wl, bl) = params
    h = jnp.dot(x, w1.T.astype(bf16), preferred_element_type=jnp.float32) + b1
    h = jnp.maximum(h, 0.0).astype(bf16)
    h = jnp.dot(h, w2.T.astype(bf16), preferred_element_type=jnp.float32) + b2
    h = jnp.maximum(h, 0.0).astype(bf16)
    return jnp.dot(h, wl.T.astype(bf16), preferred_element_type=jnp.float32) + bl


if __name__ == "__main__":
    key = jax.random.PRNGKey(0)
    k_x, k1, k2, k3 = jax.random.split(key, 4)

    batch = 8
    hidden_sizes = [128, 128]
    input_size = 784  # 1 * 28 * 28, hardcoded in the module

    x = jax.random.normal(k_x, (batch, 1, 28, 28), dtype=jnp.float32)

    params = []
    in_f = input_size
    for k, h in zip((k1, k2), hidden_sizes):
        params.append(init_linear(k, in_f, h))
        in_f = h
    params.append(init_linear(k3, in_f, 10))  # last_layer

    prepared = prepare_params(params)   # one-time transpose / pad / bf16 cast

    logits = mnist_forward(x, prepared)
    logits = jax.block_until_ready(logits)

    ref_bf16 = reference_forward_bf16(x, params)
    ref_f32 = reference_forward_f32(x, params)

    assert logits.shape == (batch, 10)
    # tight check vs. a reference with identical bf16/f32-accum numerics
    assert jnp.allclose(logits, ref_bf16, atol=2e-2, rtol=2e-2)
    # loose check vs. the full-f32 PyTorch-semantics reference
    assert jnp.allclose(logits, ref_f32, atol=1e-1)

    print("KERNEL_OK")
</pallas_src>

<mosaic_0001>
module attributes {stable_mosaic.version = 11 : i64} {
  func.func @mlp_kernel(%arg0: i32, %arg1: memref<8x896xbf16, #tpu.memory_space<vmem>>, %arg2: memref<896x128xbf16, #tpu.memory_space<vmem>>, %arg3: memref<1x128xf32, #tpu.memory_space<vmem>>, %arg4: memref<128x128xbf16, #tpu.memory_space<vmem>>, %arg5: memref<1x128xf32, #tpu.memory_space<vmem>>, %arg6: memref<128x128xbf16, #tpu.memory_space<vmem>>, %arg7: memref<1x128xf32, #tpu.memory_space<vmem>>, %arg8: memref<8x128xf32, #tpu.memory_space<vmem>>) attributes {dimension_semantics = [#tpu.dimension_semantics<parallel>], iteration_bounds = array<i64: 1>, scalar_prefetch = 0 : i64, scratch_operands = 0 : i64, tpu.core_type = #tpu.core_type<tc>, window_params = [{transform_indices = @transform_0, window_bounds = array<i64: 8, 896>}, {pipeline_mode = #tpu.pipeline_mode<synchronous>, transform_indices = @transform_1, window_bounds = array<i64: 896, 128>}, {pipeline_mode = #tpu.pipeline_mode<synchronous>, transform_indices = @transform_2, window_bounds = array<i64: 1, 128>}, {pipeline_mode = #tpu.pipeline_mode<synchronous>, transform_indices = @transform_3, window_bounds = array<i64: 128, 128>}, {pipeline_mode = #tpu.pipeline_mode<synchronous>, transform_indices = @transform_4, window_bounds = array<i64: 1, 128>}, {pipeline_mode = #tpu.pipeline_mode<synchronous>, transform_indices = @transform_5, window_bounds = array<i64: 128, 128>}, {pipeline_mode = #tpu.pipeline_mode<synchronous>, transform_indices = @transform_6, window_bounds = array<i64: 1, 128>}, {transform_indices = @transform_7, window_bounds = array<i64: 8, 128>}]} {
    %c0 = arith.constant 0 : index
    %c0_0 = arith.constant 0 : index
    %0 = vector.load %arg1[%c0, %c0_0] : memref<8x896xbf16, #tpu.memory_space<vmem>>, vector<8x896xbf16>
    %c0_1 = arith.constant 0 : index
    %c0_2 = arith.constant 0 : index
    %1 = vector.load %arg2[%c0_1, %c0_2] : memref<896x128xbf16, #tpu.memory_space<vmem>>, vector<896x128xbf16>
    %cst = arith.constant dense<0.000000e+00> : vector<8x128xf32>
    %2 = tpu.matmul %0, %1, %cst {dimension_numbers = #tpu.dot_dimension_numbers<[1], [0], [0], [1], [0, 0, 1, 1], [], []>} : vector<8x896xbf16>, vector<896x128xbf16>, vector<8x128xf32> -> vector<8x128xf32>
    %c0_3 = arith.constant 0 : index
    %c0_4 = arith.constant 0 : index
    %3 = vector.load %arg3[%c0_3, %c0_4] : memref<1x128xf32, #tpu.memory_space<vmem>>, vector<1x128xf32>
    %4 = vector.broadcast %3 : vector<1x128xf32> to vector<8x128xf32>
    %5 = arith.addf %2, %4 : vector<8x128xf32>
    %cst_5 = arith.constant 0.000000e+00 : f32
    %6 = vector.broadcast %cst_5 : f32 to vector<8x128xf32>
    %7 = arith.maximumf %5, %6 : vector<8x128xf32>
    %8 = arith.truncf %7 : vector<8x128xf32> to vector<8x128xbf16>
    %c0_6 = arith.constant 0 : index
    %c0_7 = arith.constant 0 : index
    %9 = vector.load %arg4[%c0_6, %c0_7] : memref<128x128xbf16, #tpu.memory_space<vmem>>, vector<128x128xbf16>
    %cst_8 = arith.constant dense<0.000000e+00> : vector<8x128xf32>
    %10 = tpu.matmul %8, %9, %cst_8 {dimension_numbers = #tpu.dot_dimension_numbers<[1], [0], [0], [1], [0, 0, 1, 1], [], []>} : vector<8x128xbf16>, vector<128x128xbf16>, vector<8x128xf32> -> vector<8x128xf32>
    %c0_9 = arith.constant 0 : index
    %c0_10 = arith.constant 0 : index
    %11 = vector.load %arg5[%c0_9, %c0_10] : memref<1x128xf32, #tpu.memory_space<vmem>>, vector<1x128xf32>
    %12 = vector.broadcast %11 : vector<1x128xf32> to vector<8x128xf32>
    %13 = arith.addf %10, %12 : vector<8x128xf32>
    %cst_11 = arith.constant 0.000000e+00 : f32
    %14 = vector.broadcast %cst_11 : f32 to vector<8x128xf32>
    %15 = arith.maximumf %13, %14 : vector<8x128xf32>
    %16 = arith.truncf %15 : vector<8x128xf32> to vector<8x128xbf16>
    %c0_12 = arith.constant 0 : index
    %c0_13 = arith.constant 0 : index
    %17 = vector.load %arg6[%c0_12, %c0_13] : memref<128x128xbf16, #tpu.memory_space<vmem>>, vector<128x128xbf16>
    %cst_14 = arith.constant dense<0.000000e+00> : vector<8x128xf32>
    %18 = tpu.matmul %16, %17, %cst_14 {dimension_numbers = #tpu.dot_dimension_numbers<[1], [0], [0], [1], [0, 0, 1, 1], [], []>} : vector<8x128xbf16>, vector<128x128xbf16>, vector<8x128xf32> -> vector<8x128xf32>
    %c0_15 = arith.constant 0 : index
    %c0_16 = arith.constant 0 : index
    %19 = vector.load %arg7[%c0_15, %c0_16] : memref<1x128xf32, #tpu.memory_space<vmem>>, vector<1x128xf32>
    %20 = vector.broadcast %19 : vector<1x128xf32> to vector<8x128xf32>
    %21 = arith.addf %18, %20 : vector<8x128xf32>
    %c0_17 = arith.constant 0 : index
    %c0_18 = arith.constant 0 : index
    %22 = vector.load %arg8[%c0_17, %c0_18] : memref<8x128xf32, #tpu.memory_space<vmem>>, vector<8x128xf32>
    tpu.vector_store %arg8[%c0_17, %c0_18], %21 {strides = array<i32>} : memref<8x128xf32, #tpu.memory_space<vmem>>, vector<8x128xf32>,
    return
  }
  func.func @transform_0(%arg0: i32) -> (i32, i32) {
    %c0_i32 = arith.constant 0 : i32
    %c0_i32_0 = arith.constant 0 : i32
    return %arg0, %c0_i32 : i32, i32
  }
  func.func @transform_1(%arg0: i32) -> (i32, i32) {
    %c0_i32 = arith.constant 0 : i32
    %c0_i32_0 = arith.constant 0 : i32
    %c0_i32_1 = arith.constant 0 : i32
    return %c0_i32, %c0_i32_0 : i32, i32
  }
  func.func @transform_2(%arg0: i32) -> (i32, i32) {
    %c0_i32 = arith.constant 0 : i32
    %c0_i32_0 = arith.constant 0 : i32
    %c0_i32_1 = arith.constant 0 : i32
    return %c0_i32, %c0_i32_0 : i32, i32
  }
  func.func @transform_3(%arg0: i32) -> (i32, i32) {
    %c0_i32 = arith.constant 0 : i32
    %c0_i32_0 = arith.constant 0 : i32
    %c0_i32_1 = arith.constant 0 : i32
    return %c0_i32, %c0_i32_0 : i32, i32
  }
  func.func @transform_4(%arg0: i32) -> (i32, i32) {
    %c0_i32 = arith.constant 0 : i32
    %c0_i32_0 = arith.constant 0 : i32
    %c0_i32_1 = arith.constant 0 : i32
    return %c0_i32, %c0_i32_0 : i32, i32
  }
  func.func @transform_5(%arg0: i32) -> (i32, i32) {
    %c0_i32 = arith.constant 0 : i32
    %c0_i32_0 = arith.constant 0 : i32
    %c0_i32_1 = arith.constant 0 : i32
    return %c0_i32, %c0_i32_0 : i32, i32
  }
  func.func @transform_6(%arg0: i32) -> (i32, i32) {
    %c0_i32 = arith.constant 0 : i32
    %c0_i32_0 = arith.constant 0 : i32
    %c0_i32_1 = arith.constant 0 : i32
    return %c0_i32, %c0_i32_0 : i32, i32
  }
  func.func @transform_7(%arg0: i32) -> (i32, i32) {
    %c0_i32 = arith.constant 0 : i32
    %c0_i32_0 = arith.constant 0 : i32
    return %arg0, %c0_i32 : i32, i32
  }
}

</mosaic_0001>

<bundles_post_ra>
// kernel: tpu_custom_call.1
= control target key start
LH: loop header
LB: loop body
LE: loop exit
PB: predicated region body
PF: predicated region fallthrough
CT: control target
= control target key end

     0   :  { %12 = vsyncpa [#allocation3], 0  ;;  %s1512_s0 = inlined_call_operand.hbm [shape: bf16[8,896], index: 0, kind: input, shape index: {}]   ;;  %s1513_s1 = inlined_call_operand.hbm [shape: bf16[896,128], index: 1, kind: input, shape index: {}]   ;;  %s1514_s2 = inlined_call_operand.vmem [shape: f32[1,128], index: 2, kind: input, shape index: {}]   ;;  %s1515_s3 = inlined_call_operand.hbm [shape: bf16[128,128], index: 3, kind: input, shape index: {}]   ;;  %s1516_s4 = inlined_call_operand.vmem [shape: f32[1,128], index: 4, kind: input, shape index: {}]   ;;  %s1517_s5 = inlined_call_operand.hbm [shape: bf16[128,128], index: 5, kind: input, shape index: {}]   ;;  %s1518_s6 = inlined_call_operand.vmem [shape: f32[1,128], index: 6, kind: input, shape index: {}]   ;;  %s1519_s7 = inlined_call_operand.hbm [shape: f32[8,128], index: 7, kind: output, shape index: {}]  }
   0x1   :  { %13 = vsyncpa [#allocation6], 0 }
   0x2   :  { %14 = vsyncpa [#allocation9], 0 }
   0x3   :  { %15 = vsyncpa [#allocation4], 0  ;;  %s1400_s24 = smov [#allocation5]  }
   0x4   :  { %s31_s25 = sshll.u32 %s1400_s24, 4  ;;  %s32_s25 = int_to_ptr.vmem [resolvable:$true] %s31_s25 }
   0x5   :  { %s1300_s26 = scalar_lea.vmem %s32_s25, 7168  ;;  %p1305_p1 = scmp.lt.s32.totalorder %s32_s25, %s32_s25 }
   0x6   :  { %p1301_p0 = scmp.ne.s32.totalorder %s32_s25, %s1300_s26  ;;  %p1306_p2 = scmp.lt.s32.totalorder %s1300_s26, %s1300_s26 }
   0x8   :  { %p1307_p3 = por %p1306_p2, %p1305_p1 }
   0xa   :  { %p1308_p4 = pnand %p1307_p3, %p1301_p0 }
   0xc   :  { %1311 = shalt.err (!%p1308_p4)
}
   0xd   :  { %s1401_s27 = smov 64   ;;  %s1402_s28 = smov 4  }
   0xe   :  { %37 = dma.hbm_to_vmem [thread:$0]  %s1513_s1, 7168, %s32_s25, [#allocation6], %s1401_s27, %s1401_s27, %s1402_s28  }
   0xf   :  { %s1403_s8 = smov [#allocation2]   ;;  %s1404_s10 = smov [#allocation7]  }
  0x10   :  { %s22_s9 = sshll.u32 %s1403_s8, 4  ;;  %s45_s11 = sshll.u32 %s1404_s10, 4  ;;  %s23_s9 = int_to_ptr.vmem [resolvable:$true] %s22_s9  ;;  %s46_s11 = int_to_ptr.vmem [resolvable:$true] %s45_s11 }
  0x11   :  { %s1320_s12 = scalar_lea.vmem %s23_s9, 448  ;;  %p1325_p6 = scmp.lt.s32.totalorder %s23_s9, %s23_s9 }
  0x12   :  { %p1321_p5 = scmp.ne.s32.totalorder %s23_s9, %s1320_s12  ;;  %p1326_p7 = scmp.lt.s32.totalorder %s1320_s12, %s1320_s12 }
  0x14   :  { %p1327_p8 = por %p1326_p7, %p1325_p6 }
  0x16   :  { %p1328_p9 = pnand %p1327_p8, %p1321_p5 }
  0x18   :  { %1331 = shalt.err (!%p1328_p9)
}
  0x19   :  { %25 = dma.hbm_to_vmem [thread:$0]  %s1512_s0, 448, %s23_s9, [#allocation3]  }
  0x1a   :  { %s1340_s15 = scalar_lea.vmem %s46_s11, 1024  ;;  %p1345_p11 = scmp.lt.s32.totalorder %s46_s11, %s46_s11 }
  0x1b   :  { %p1341_p10 = scmp.ne.s32.totalorder %s46_s11, %s1340_s15  ;;  %p1346_p12 = scmp.lt.s32.totalorder %s1340_s15, %s1340_s15 }
  0x1d   :  { %p1347_p13 = por %p1346_p12, %p1345_p11 }
  0x1f   :  { %p1348_p0 = pnand %p1347_p13, %p1341_p10 }
  0x21   :  { %1351 = shalt.err (!%p1348_p0)
}
  0x22   :  { %51 = dma.hbm_to_vmem [thread:$0]  %s1515_s3, 1024, %s46_s11, [#allocation6], %s1401_s27, %s1401_s27, %s1402_s28  }
  0x23   :  { %s1405_s17 = smov [#allocation8]  }
  0x24   :  { %s59_s18 = sshll.u32 %s1405_s17, 4  ;;  %s60_s18 = int_to_ptr.vmem [resolvable:$true] %s59_s18 }
  0x25   :  { %s1360_s19 = scalar_lea.vmem %s60_s18, 1024  ;;  %p1365_p2 = scmp.lt.s32.totalorder %s60_s18, %s60_s18 }
  0x26   :  { %p1361_p1 = scmp.ne.s32.totalorder %s60_s18, %s1360_s19  ;;  %p1366_p3 = scmp.lt.s32.totalorder %s1360_s19, %s1360_s19 }
  0x28   :  { %p1367_p4 = por %p1366_p3, %p1365_p2 }
  0x2a   :  { %p1368_p5 = pnand %p1367_p4, %p1361_p1 }
  0x2c   :  { %1371 = shalt.err (!%p1368_p5)
}
  0x2d   :  { %65 = dma.hbm_to_vmem [thread:$0]  %s1517_s5, 1024, %s60_s18, [#allocation9], %s1401_s27, %s1401_s27, %s1402_s28  }
  0x2e   :  { %1392 = dma.done.wait [#allocation3], 448  }
  0x2f   :  { %1393 = vsyncadd [#allocation3], 4294966848 }
  0x30   :  { %1394 = dma.done.wait [#allocation6], 8192  }
  0x31   :  { %1395 = vsyncadd [#allocation6], 4294959104 }
  0x32   :  { %1396 = dma.done.wait [#allocation9], 1024  }
  0x33   :  { %1397 = vsyncadd [#allocation9], 4294966272  ;;  %v1213_v0 = vld [vmem:[#allocation5 + $0x78] sm:$0xff]   ;;  %v1217_v4 = vld [vmem:[#allocation5 + $0x70] sm:$0xff]   ;;  %v1406_v39 = vmov 0.0   ;;  %vm1407_vm0 = vmmov 0  }
  0x34   :  { %v1214_v1 = vld [vmem:[#allocation5 + $0xf8] sm:$0xff]   ;;  %1051 = vmatprep.subr.bf16.mxu0 %v1213_v0  ;;  %v1218_v5 = vld [vmem:[#allocation5 + $0xf0] sm:$0xff]   ;;  %v1221_v8 = vld [vmem:[#allocation5 + $0x68] sm:$0xff]   ;;  %s1408_s24 = smov [#allocation10]  }
  0x35   :  { %v1215_v2 = vld [vmem:[#allocation5 + $0x38] sm:$0xff]   ;;  %1073 = vmatprep.subr.bf16.mxu1 %v1214_v1  ;;  %v1219_v6 = vld [vmem:[#allocation5 + $0x30] sm:$0xff]   ;;  %v1222_v9 = vld [vmem:[#allocation5 + $0xe8] sm:$0xff]   ;;  %s958_s25 = sshll.u32 %s1408_s24, 4  ;;  %s959_s25 = int_to_ptr.vmem [resolvable:$true] %s958_s25 }
  0x36   :  { %v1216_v3 = vld [vmem:[#allocation5 + $0xb8] sm:$0xff]   ;;  %1052 = vmatpush3.bf16.msra.mxu0 %v1215_v2  ;;  %v1220_v7 = vld [vmem:[#allocation5 + $0xb0] sm:$0xff]   ;;  %v1223_v10 = vld [vmem:[#allocation5 + $0x28] sm:$0xff]   ;;  %p1377_p7 = scmp.lt.s32.totalorder %s959_s25, %s959_s25 }
  0x37   :  { %1074 = vmatpush3.bf16.msra.mxu1 %v1216_v3  ;;  %1053 = vmatprep.subr.bf16.mxu0 %v1217_v4  ;;  %v1224_v11 = vld [vmem:[#allocation5 + $0xa8] sm:$0xff]   ;;  %v1225_v12 = vld [vmem:[#allocation5 + $0x60] sm:$0xff]   ;;  %v1229_v16 = vld [vmem:[#allocation5 + $0x58] sm:$0xff]  }
  0x38   :  { %1075 = vmatprep.subr.bf16.mxu1 %v1218_v5  ;;  %v1226_v13 = vld [vmem:[#allocation5 + $0xe0] sm:$0xff]   ;;  %v1230_v17 = vld [vmem:[#allocation5 + $0xd8] sm:$0xff]   ;;  %v1233_v20 = vld [vmem:[#allocation5 + $0x50] sm:$0xff]  }
  0x39   :  { %v1227_v14 = vld [vmem:[#allocation5 + $0x20] sm:$0xff]   ;;  %v1231_v18 = vld [vmem:[#allocation5 + $0x18] sm:$0xff]   ;;  %v1234_v21 = vld [vmem:[#allocation5 + $0xd0] sm:$0xff]  }
  0x3a   :  { %1054 = vmatpush3.bf16.msra.mxu0 %v1219_v6  ;;  %v1228_v15 = vld [vmem:[#allocation5 + $0xa0] sm:$0xff]   ;;  %v1232_v19 = vld [vmem:[#allocation5 + $0x98] sm:$0xff]   ;;  %v1235_v22 = vld [vmem:[#allocation5 + $0x10] sm:$0xff]  }
  0x3b   :  { %1076 = vmatpush3.bf16.msra.mxu1 %v1220_v7  ;;  %1055 = vmatprep.subr.bf16.mxu0 %v1221_v8  ;;  %v1236_v23 = vld [vmem:[#allocation5 + $0x90] sm:$0xff]   ;;  %v1237_v24 = vld [vmem:[#allocation5 + $0x48] sm:$0xff]   ;;  %v1241_v28 = vld [vmem:[#allocation5 + $0x40] sm:$0xff]  }
  0x3c   :  { %1077 = vmatprep.subr.bf16.mxu1 %v1222_v9  ;;  %v1238_v25 = vld [vmem:[#allocation5 + $0xc8] sm:$0xff]   ;;  %v1242_v29 = vld [vmem:[#allocation5 + $0xc0] sm:$0xff]   ;;  %v1249_v38 = vld [vmem:[#allocation5 + $0x178] sm:$0xff]  }
  0x3d   :  { %v1239_v26 = vld [vmem:[#allocation5 + $0x8] sm:$0xff]   ;;  %v1243_v30 = vld [vmem:[#allocation5] sm:$0xff]   ;;  %v1250_v40 = vld [vmem:[#allocation5 + $0x138] sm:$0xff]  }
  0x3e   :  { %1056 = vmatpush3.bf16.msra.mxu0 %v1223_v10  ;;  %v1240_v27 = vld [vmem:[#allocation5 + $0x88] sm:$0xff]   ;;  %v1244_v31 = vld [vmem:[#allocation5 + $0x80] sm:$0xff]   ;;  %v1251_v41 = vld [vmem:[#allocation5 + $0x1b8] sm:$0xff]  }
  0x3f   :  { %1078 = vmatpush3.bf16.msra.mxu1 %v1224_v11  ;;  %1057 = vmatprep.subr.bf16.mxu0 %v1225_v12  ;;  %v81_v32 = vld [vmem:[#allocation2] sm:$0xff]  ;;  %v82_v33 = vld [vmem:[#allocation2 + $0x8] sm:$0xff]  ;;  %v1261_v51 = vld [vmem:[#allocation5 + $0x158] sm:$0xff]  }
  0x40   :  { %1079 = vmatprep.subr.bf16.mxu1 %v1226_v13  ;;  %v970_v34 = vcombine.low %v81_v32, %v81_v32  ;;  %v971_v35 = vcombine.high %v81_v32, %v81_v32  ;;  %v972_v36 = vcombine.low %v82_v33, %v82_v33  ;;  %v973_v37 = vcombine.high %v82_v33, %v82_v33  ;;  %v1252_v42 = vld [vmem:[#allocation5 + $0x170] sm:$0xff]   ;;  %v1255_v45 = vld [vmem:[#allocation5 + $0x168] sm:$0xff]   ;;  %v1258_v48 = vld [vmem:[#allocation5 + $0x160] sm:$0xff]  }
  0x41   :  { %v1253_v43 = vld [vmem:[#allocation5 + $0x130] sm:$0xff]   ;;  %v1256_v46 = vld [vmem:[#allocation5 + $0x128] sm:$0xff]   ;;  %v1259_v49 = vld [vmem:[#allocation5 + $0x120] sm:$0xff]  }
  0x42   :  { %1058 = vmatpush3.bf16.msra.mxu0 %v1227_v14  ;;  %597 = vmatprep.mubr.bf16.mxu0 %v971_v35  ;;  %v1254_v44 = vld [vmem:[#allocation5 + $0x1b0] sm:$0xff]   ;;  %v1257_v47 = vld [vmem:[#allocation5 + $0x1a8] sm:$0xff]   ;;  %v1260_v50 = vld [vmem:[#allocation5 + $0x1a0] sm:$0xff]  }
  0x43   :  { %1080 = vmatpush3.bf16.msra.mxu1 %v1228_v15  ;;  %1059 = vmatprep.subr.bf16.mxu0 %v1229_v16  ;;  %v1262_v52 = vld [vmem:[#allocation5 + $0x118] sm:$0xff]   ;;  %v1264_v54 = vld [vmem:[#allocation5 + $0x150] sm:$0xff]   ;;  %v1267_v57 = vld [vmem:[#allocation5 + $0x148] sm:$0xff]  }
  0x44   :  { %1081 = vmatprep.subr.bf16.mxu1 %v1230_v17  ;;  %637 = vmatprep.mubr.bf16.mxu1 %v973_v37  ;;  %v1263_v53 = vld [vmem:[#allocation5 + $0x198] sm:$0xff]   ;;  %v1265_v55 = vld [vmem:[#allocation5 + $0x110] sm:$0xff]   ;;  %v1268_v58 = vld [vmem:[#allocation5 + $0x108] sm:$0xff]  }
  0x45   :  { %v1266_v56 = vld [vmem:[#allocation5 + $0x190] sm:$0xff]   ;;  %v1269_v59 = vld [vmem:[#allocation5 + $0x188] sm:$0xff]   ;;  %v1270_v61 = vld [vmem:[#allocation5 + $0x140] sm:$0xff]  }
  0x46   :  { %1060 = vmatpush3.bf16.msra.mxu0 %v1231_v18  ;;  %v83_v60 = vld [vmem:[#allocation2 + $0x10] sm:$0xff]  ;;  %v1271_v63 = vld [vmem:[#allocation5 + $0x100] sm:$0xff]   ;;  %v1275_v1 = vld [vmem:[#allocation2 + $0x18] ss:$0 sps:$4 sm:$0xff]  }
  0x47   :  { %1082 = vmatpush3.bf16.msra.mxu1 %v1232_v19  ;;  %1061 = vmatprep.subr.bf16.mxu0 %v1233_v20  ;;  %v975_v62 = vcombine.high %v83_v60, %v83_v60  ;;  %v1272_v0 = vld [vmem:[#allocation5 + $0x180] sm:$0xff]   ;;  %v974_v2 = vcombine.low %v83_v60, %v83_v60  ;;  %v1276_v3 = vld [vmem:[#allocation7 + $0x38] sm:$0xff]   ;;  %v1277_v4 = vld [vmem:[#allocation7 + $0x30] sm:$0xff]  }
  0x48   :  { %1083 = vmatprep.subr.bf16.mxu1 %v1234_v21  ;;  %v1278_v5 = vld [vmem:[#allocation7 + $0x28] sm:$0xff]   ;;  %v1279_v6 = vld [vmem:[#allocation7 + $0x20] sm:$0xff]   ;;  %v1280_v7 = vld [vmem:[#allocation7 + $0x18] sm:$0xff]  }
  0x49   :  { %v1281_v8 = vld [vmem:[#allocation7 + $0x10] sm:$0xff]   ;;  %v1282_v9 = vld [vmem:[#allocation7 + $0x8] sm:$0xff]   ;;  %v1283_v10 = vld [vmem:[#allocation7] sm:$0xff]  }
  0x4a   :  { %1062 = vmatpush3.bf16.msra.mxu0 %v1235_v22  ;;  %v1284_v11 = vld [vmem:[#allocation8 + $0x38] sm:$0xff]   ;;  %v1285_v12 = vld [vmem:[#allocation8 + $0x30] sm:$0xff]   ;;  %v1286_v13 = vld [vmem:[#allocation8 + $0x28] sm:$0xff]  }
  0x4b   :  { %1084 = vmatpush3.bf16.msra.mxu1 %v1236_v23  ;;  %1063 = vmatprep.subr.bf16.mxu0 %v1237_v24  ;;  %v1287_v14 = vld [vmem:[#allocation8 + $0x20] sm:$0xff]   ;;  %v1288_v15 = vld [vmem:[#allocation8 + $0x18] sm:$0xff]   ;;  %v1289_v16 = vld [vmem:[#allocation8 + $0x10] sm:$0xff]  }
  0x4c   :  { %1085 = vmatprep.subr.bf16.mxu1 %v1238_v25 }
  0x4e   :  { %1064 = vmatpush3.bf16.msra.mxu0 %v1239_v26  ;;  %v969_v26 = vld [vmem:[%s1514_s2] ss:$0 sm:$0xff] }
  0x4f   :  { %1086 = vmatpush3.bf16.msra.mxu1 %v1240_v27  ;;  %1065 = vmatprep.subr.bf16.mxu0 %v1241_v28 }
  0x50   :  { %1087 = vmatprep.subr.bf16.mxu1 %v1242_v29 }
  0x52   :  { %1066 = vmatpush3.bf16.msra.mxu0 %v1243_v30 }
  0x53   :  { %1088 = vmatpush3.bf16.msra.mxu1 %v1244_v31  ;;  %1095 = vmatprep.subr.bf16.mxu0 %v1249_v38 }
  0x54   :  { %1144 = vmatprep.subr.bf16.mxu1 %v1406_v39 }
  0x55   :  { %598 = vmatmul.mubr.bf16.vlgmr.msra.gmra.mxu0 %v970_v34 }
  0x56   :  { %638 = vmatmul.mubr.bf16.vlgmr.msra.gmra.mxu1 %v972_v36  ;;  %1096 = vmatpush3.bf16.msra.mxu0 %v1250_v40 }
  0x57   :  { %1145 = vmatpush3.bf16.msra.mxu1 %v1251_v41  ;;  %1097 = vmatprep.subr.bf16.mxu0 %v1252_v42 }
  0x58   :  { %1146 = vmatprep.subr.bf16.mxu1 %v1406_v39  ;;  %1160 = vmatprep.mubr.msk.bf16.mxu1 %vm1407_vm0, %v1406_v39 }
  0x59   :  { %677 = vmatprep.mubr.bf16.mxu0 %v975_v62 }
  0x5a   :  { %1098 = vmatpush3.bf16.msra.mxu0 %v1253_v43 }
  0x5b   :  { %1147 = vmatpush3.bf16.msra.mxu1 %v1254_v44  ;;  %1099 = vmatprep.subr.bf16.mxu0 %v1255_v45  ;;  %v1290_v44 = vld [vmem:[#allocation8 + $0x8] sm:$0xff]   ;;  %v1291_v45 = vld [vmem:[#allocation8] sm:$0xff]  }
  0x5c   :  { %1148 = vmatprep.subr.bf16.mxu1 %v1406_v39 }
  0x5e   :  { %1100 = vmatpush3.bf16.msra.mxu0 %v1256_v46  ;;  %v1033_v46 = vld [vmem:[%s1516_s4] ss:$0 sm:$0xff]  ;;  %s1372_s4 = scalar_lea.vmem %s959_s25, 128 }
  0x5f   :  { %1149 = vmatpush3.bf16.msra.mxu1 %v1257_v47  ;;  %1101 = vmatprep.subr.bf16.mxu0 %v1258_v48  ;;  %p1373_p6 = scmp.ne.s32.totalorder %s959_s25, %s1372_s4  ;;  %p1378_p8 = scmp.lt.s32.totalorder %s1372_s4, %s1372_s4 }
  0x60   :  { %1150 = vmatprep.subr.bf16.mxu1 %v1406_v39 }
  0x61   :  { %p1379_p9 = por %p1378_p8, %p1377_p7 }
  0x62   :  { %1102 = vmatpush3.bf16.msra.mxu0 %v1259_v49 }
  0x63   :  { %1151 = vmatpush3.bf16.msra.mxu1 %v1260_v50  ;;  %1103 = vmatprep.subr.bf16.mxu0 %v1261_v51  ;;  %p1380_p10 = pnand %p1379_p9, %p1373_p6 }
  0x64   :  { %1152 = vmatprep.subr.bf16.mxu1 %v1406_v39 }
  0x66   :  { %1104 = vmatpush3.bf16.msra.mxu0 %v1262_v52 }
  0x67   :  { %1153 = vmatpush3.bf16.msra.mxu1 %v1263_v53  ;;  %1105 = vmatprep.subr.bf16.mxu0 %v1264_v54  ;;  %v1042_v54 = vld [vmem:[%s1518_s6] ss:$0 sm:$0xff] }
  0x68   :  { %1154 = vmatprep.subr.bf16.mxu1 %v1406_v39 }
  0x6a   :  { %1106 = vmatpush3.bf16.msra.mxu0 %v1265_v55 }
  0x6b   :  { %1155 = vmatpush3.bf16.msra.mxu1 %v1266_v56  ;;  %1107 = vmatprep.subr.bf16.mxu0 %v1267_v57 }
  0x6c   :  { %1156 = vmatprep.subr.bf16.mxu1 %v1406_v39 }
  0x6e   :  { %1108 = vmatpush3.bf16.msra.mxu0 %v1268_v58 }
  0x6f   :  { %1157 = vmatpush3.bf16.msra.mxu1 %v1269_v59  ;;  %1109 = vmatprep.subr.bf16.mxu0 %v1270_v61 }
  0x70   :  { %1158 = vmatprep.subr.bf16.mxu1 %v1406_v39 }
  0x72   :  { %1110 = vmatpush3.bf16.msra.mxu0 %v1271_v63 }
  0x73   :  { %1159 = vmatpush3.bf16.msra.mxu1 %v1272_v0  ;;  %1164 = vmatprep.subr.bf16.mxu0 %v1406_v39 }
  0x74   :  { %1184 = vmatprep.subr.bf16.mxu1 %v1406_v39 }
  0x75   :  { %678 = vmatmul.mubr.bf16.vlgmr.msra.gmra.mxu0 %v974_v2 }
  0x76   :  { %1161 = vmatmul.mubr.bf16.vlgmr.msra.gmra.mxu1 %v1275_v1  ;;  %1180 = vmatprep.mubr.msk.bf16.mxu0 %vm1407_vm0, %v1406_v39 }
  0x77   :  { %1200 = vmatprep.mubr.msk.bf16.mxu1 %vm1407_vm0, %v1406_v39  ;;  %1165 = vmatpush3.bf16.msra.mxu0 %v1276_v3 }
  0x78   :  { %1166 = vmatprep.subr.bf16.mxu0 %v1406_v39  ;;  %1185 = vmatpush3.bf16.msra.mxu1 %v1284_v11 }
  0x79   :  { %1186 = vmatprep.subr.bf16.mxu1 %v1406_v39 }
  0x7b   :  { %1167 = vmatpush3.bf16.msra.mxu0 %v1277_v4 }
  0x7c   :  { %1168 = vmatprep.subr.bf16.mxu0 %v1406_v39  ;;  %1187 = vmatpush3.bf16.msra.mxu1 %v1285_v12 }
  0x7d   :  { %1188 = vmatprep.subr.bf16.mxu1 %v1406_v39 }
  0x7f   :  { %1169 = vmatpush3.bf16.msra.mxu0 %v1278_v5 }
  0x80   :  { %1170 = vmatprep.subr.bf16.mxu0 %v1406_v39  ;;  %1189 = vmatpush3.bf16.msra.mxu1 %v1286_v13 }
  0x81   :  { %1190 = vmatprep.subr.bf16.mxu1 %v1406_v39 }
  0x83   :  { %1171 = vmatpush3.bf16.msra.mxu0 %v1279_v6 }
  0x84   :  { %1172 = vmatprep.subr.bf16.mxu0 %v1406_v39  ;;  %1191 = vmatpush3.bf16.msra.mxu1 %v1287_v14 }
  0x85   :  { %1192 = vmatprep.subr.bf16.mxu1 %v1406_v39 }
  0x87   :  { %1173 = vmatpush3.bf16.msra.mxu0 %v1280_v7 }
  0x88   :  { %1174 = vmatprep.subr.bf16.mxu0 %v1406_v39  ;;  %1193 = vmatpush3.bf16.msra.mxu1 %v1288_v15 }
  0x89   :  { %1194 = vmatprep.subr.bf16.mxu1 %v1406_v39 }
  0x8b   :  { %1175 = vmatpush3.bf16.msra.mxu0 %v1281_v8 }
  0x8c   :  { %1176 = vmatprep.subr.bf16.mxu0 %v1406_v39  ;;  %1195 = vmatpush3.bf16.msra.mxu1 %v1289_v16 }
  0x8d   :  { %1196 = vmatprep.subr.bf16.mxu1 %v1406_v39 }
  0x8f   :  { %1177 = vmatpush3.bf16.msra.mxu0 %v1282_v9 }
  0x90   :  { %1178 = vmatprep.subr.bf16.mxu0 %v1406_v39  ;;  %1197 = vmatpush3.bf16.msra.mxu1 %v1290_v44 }
  0x91   :  { %1198 = vmatprep.subr.bf16.mxu1 %v1406_v39 }
  0x93   :  { %1179 = vmatpush3.bf16.msra.mxu0 %v1283_v10 }
  0x94   :  { %1199 = vmatpush3.bf16.msra.mxu1 %v1291_v45 }
 0x115   :  { %v1067_v17 = vpop.f32.mrf.mxu0 }
 0x116   :  { %v1089_v18 = vpop.f32.mrf.mxu1 }
 0x117   :  { %v1068_v19 = vpop.f32.mrf.mxu0 }
 0x118   :  { %v1090_v20 = vpop.f32.mrf.mxu1  ;;  %v1069_v25 = vadd.f32 %v1068_v19, %v1067_v17 }
 0x119   :  { %v1070_v21 = vpop.f32.mrf.mxu0  ;;  %v1091_v28 = vadd.f32 %v1090_v20, %v1089_v18 }
 0x11a   :  { %v1092_v22 = vpop.f32.mrf.mxu1  ;;  %v600_v27 = vadd.f32 %v1069_v25, %v969_v26 }
 0x11b   :  { %v1071_v23 = vpop.f32.mrf.mxu0 }
 0x11c   :  { %v1093_v24 = vpop.f32.mrf.mxu1  ;;  %v640_v32 = vadd.f32 %v1091_v28, %v600_v27 }
 0x135   :  { %v1111_v29 = vpop.f32.mrf.mxu0 }
 0x136   :  { %v719_v30 = vpop.f32.mrf.mxu1 }
 0x137   :  { %v1112_v31 = vpop.f32.mrf.mxu0 }
 0x138   :  { %v1113_v33 = vadd.f32 %v1112_v31, %v1111_v29  ;;  %v1162_v34 = vpop.f32.mrf.mxu1 }
 0x139   :  { %v1114_v35 = vpop.f32.mrf.mxu0 }
 0x13a   :  { %v680_v36 = vadd.f32 %v1113_v33, %v640_v32  ;;  %v722_v37 = vpop.f32.mrf.mxu1 }
 0x13b   :  { %v1115_v38 = vpop.f32.mrf.mxu0 }
 0x13c   :  { %v720_v40 = vadd.f32 %v719_v30, %v680_v36  ;;  %v1163_v41 = vpop.f32.mrf.mxu1 }
 0x13e   :  { %v725_v42 = vmax.f32 %v720_v40, 0.0 }
 0x140   :  { %v726_v43 = vpack.c.bf16 %v725_v42, %v725_v42 }
 0x142   :  { %1181 = vmatmul.mubr.bf16.vlgmr.msra.gmra.mxu0 %v726_v43 }
 0x202   :  { %v832_v47 = vpop.f32.mrf.mxu0 }
 0x203   :  { %v833_v48 = vadd.f32 %v1033_v46, %v832_v47 }
 0x204   :  { %v1182_v49 = vpop.f32.mrf.mxu0 }
 0x205   :  { %v838_v50 = vmax.f32 %v833_v48, 0.0 }
 0x206   :  { %v835_v51 = vpop.f32.mrf.mxu0 }
 0x207   :  { %v839_v52 = vpack.c.bf16 %v838_v50, %v838_v50 }
 0x208   :  { %v1183_v53 = vpop.f32.mrf.mxu0 }
 0x209   :  { %1201 = vmatmul.mubr.bf16.vlgmr.msra.gmra.mxu1 %v839_v52 }
 0x2c9   :  { %v945_v39 = vpop.f32.mrf.mxu1 }
 0x2ca   :  { %v946_v55 = vadd.f32 %v1042_v54, %v945_v39 }
 0x2cb   :  { %v1202_v56 = vpop.f32.mrf.mxu1 }
 0x2cc   :  { %951 = vst [vmem:[#allocation10] sm:$0xff] %v946_v55 }
 0x2cd   :  { %v948_v57 = vpop.f32.mrf.mxu1 }
 0x2ce   :  { %1383 = shalt.err (!%p1380_p10)
}
 0x2cf   :  { %961 = dma.vmem_to_hbm [thread:$0]  %s959_s25, 128, %s1519_s7, [#allocation4]   ;;  %v1203_v58 = vpop.f32.mrf.mxu1 }
 0x2d0   :  { %1398 = dma.done.wait [#allocation4], 128  }
 0x2d1   :  { %1399 = vsyncadd [#allocation4], 4294967168 }
 0x2d2   :  { %965 = vsyncpa [#allocation3], 1 }
 0x2d3   :  { %966 = vsyncpa [#allocation6], 1 }
 0x2d4   :  { %967 = vsyncpa [#allocation9], 1 }
 0x2d5   :  { %968 = vsyncpa [#allocation4], 1 }

</bundles_post_ra>
